<compile_context>
chip_gen: v5e
topology: v5e:2x2
jax: 0.10.0
libtpu: 0.0.40
codegen_flags: <defaults>
</compile_context>

<pallas_src>
import functools

import jax
import jax.numpy as jnp
from jax import lax
from jax.experimental import pallas as pl
from jax.experimental.pallas import tpu as pltpu

BN_EPS = 1e-5


# ----------------------------------------------------------------------------
# Pallas kernel: stride-1 InvertedResidual forward for one batch element.
#   x_ref  : (2*bf, H*W)   input block (lane-dense)
#   w1_ref : (bf, bf)      1x1 conv #1 weights (BN folded), VMEM
#   b1_ref : (bf, 1)       1x1 conv #1 bias
#   wd_ref : (9, bf, 1)    3x3 depthwise weights (BN folded), tap-major
#   w2_ref : (bf, bf)      1x1 conv #2 weights (BN folded), VMEM
#   b2_ref : (bf, 1)       1x1 conv #2 bias (depthwise bias pre-folded in)
#   o_ref  : (bf, 2*H*W)   row k = [x1[k] | branch2(x2)[k]]
# ----------------------------------------------------------------------------
def _inverted_residual_s1_kernel(bf, H, W,
                                 x_ref, w1_ref, b1_ref, wd_ref,
                                 w2_ref, b2_ref, o_ref):
    HW = H * W
    f32 = jnp.float32

    x1 = x_ref[:bf, :]                     # passthrough half (original dtype)
    x2 = x_ref[bf:, :].astype(f32)         # branch2 input, (bf, HW)

    # --- stage 1: 1x1 conv (+folded BN) + ReLU  — MXU matmul, lanes = spatial
    t = jnp.dot(w1_ref[...], x2,
                preferred_element_type=f32, precision=lax.Precision.HIGHEST)
    t = jnp.maximum(t + b1_ref[...], 0.0)

    # --- stage 2: 3x3 depthwise conv, stride 1, pad 1 (+folded BN)
    # 9 shifted MACs: pltpu.roll along the flattened spatial (lane) axis +
    # boundary masks from iota (zero padding semantics).  No padded scratch.
    lane = lax.broadcasted_iota(jnp.int32, (1, HW), 1)
    if W & (W - 1) == 0:                   # power-of-two W: pure bit ops
        col = lane & (W - 1)
        row = lane >> (W.bit_length() - 1)
    else:
        col = lane % W
        row = lane // W

    acc = None
    for dy in (-1, 0, 1):
        if dy == -1:
            m_h = row >= 1
        elif dy == 1:
            m_h = row <= H - 2
        else:
            m_h = None
        for dx in (-1, 0, 1):
            if dx == -1:
                m_w = col >= 1
            elif dx == 1:
                m_w = col <= W - 2
            else:
                m_w = None

            off = dy * W + dx
            v = t if off == 0 else pltpu.roll(t, shift=(-off) % HW, axis=1)

            if m_h is not None and m_w is not None:
                mask = jnp.logical_and(m_h, m_w)
            elif m_h is not None:
                mask = m_h
            else:
                mask = m_w
            if mask is not None:
                v = jnp.where(mask, v, 0.0)

            k = (dy + 1) * 3 + (dx + 1)
            term = wd_ref[k] * v            # (bf,1) * (bf,HW)
            acc = term if acc is None else acc + term
    # depthwise bias (+folded BN beta) is pre-folded into b2 in the wrapper.

    # --- stage 3: 1x1 conv (+folded BN) + ReLU — MXU matmul
    u = jnp.dot(w2_ref[...], acc,
                preferred_element_type=f32, precision=lax.Precision.HIGHEST)
    u = jnp.maximum(u + b2_ref[...], 0.0)

    # --- writeback: row k = [x1[k] | u[k]].  The wrapper's contiguous reshape
    # to (B, 2*bf, H, W) makes channel 2k = x1[k], 2k+1 = u[k]
    # == channel_shuffle(cat(x1, branch2(x2)), 2).  Two wide, lane-dense stores
    # (both lane offsets are multiples of 128 -> unmasked vst).
    o_ref[:, :HW] = x1.astype(o_ref.dtype)
    o_ref[:, HW:] = u.astype(o_ref.dtype)


# ----------------------------------------------------------------------------
# Wrapper
# ----------------------------------------------------------------------------
def inverted_residual(x, folded_params, stride=1):
    if stride != 1:
        raise NotImplementedError("only stride == 1 is implemented")  # TODO(synk)
    B, C, H, W = x.shape
    bf = C // 2
    HW = H * W
    w1, b1, wd, bd, w2, b2 = folded_params

    # Layout plumbing in the wrapper (free, contiguous reshapes) + exact
    # algebraic fold of the depthwise bias into the second conv bias
    # (no ReLU between depthwise-BN and the second 1x1 conv).
    x_flat = x.reshape(B, C, HW)
    b1c = b1.reshape(bf, 1)
    b2c = (w2 @ bd + b2).reshape(bf, 1)
    wdt = wd.T.reshape(9, bf, 1)            # tap-major per-channel weights

    kernel = functools.partial(_inverted_residual_s1_kernel, bf, H, W)

    def rep(shape):
        # Whole-array block, resident in VMEM, same block every grid step.
        return pl.BlockSpec(shape, lambda b, _s=shape: (0,) * len(_s))

    out_flat = pl.pallas_call(
        kernel,
        out_shape=jax.ShapeDtypeStruct((B, bf, 2 * HW), x.dtype),
        grid=(B,),
        in_specs=[
            pl.BlockSpec((None, C, HW), lambda b: (b, 0, 0)),
            rep((bf, bf)), rep((bf, 1)),
            rep((9, bf, 1)),
            rep((bf, bf)), rep((bf, 1)),
        ],
        out_specs=pl.BlockSpec((None, bf, 2 * HW), lambda b: (b, 0, 0)),
        compiler_params=pltpu.CompilerParams(dimension_semantics=("parallel",)),
    )(x_flat, w1, b1c, wdt, w2, b2c)

    # (B, bf, 2*HW): row k = [x1[k] (HW) | branch2[k] (HW)]  --contiguous-->
    # (B, 2*bf, H, W) with channel 2k = x1[k], 2k+1 = branch2[k].
    return out_flat.reshape(B, C, H, W)


# ----------------------------------------------------------------------------
# Parameter construction (deterministic) + BN folding (eval-mode BatchNorm2d)
# ----------------------------------------------------------------------------
def make_raw_params(key, bf):
    ks = jax.random.split(key, 9)
    w1 = 0.5 * jax.random.normal(ks[0], (bf, bf, 1, 1), jnp.float32)
    wd = 0.5 * jax.random.normal(ks[1], (bf, 1, 3, 3), jnp.float32)
    w2 = 0.5 * jax.random.normal(ks[2], (bf, bf, 1, 1), jnp.float32)

    def bn_params(kg, kb):
        gamma = 1.0 + 0.1 * jax.random.normal(kg, (bf,), jnp.float32)
        beta = 0.1 * jax.random.normal(kb, (bf,), jnp.float32)
        mean = jnp.zeros((bf,), jnp.float32)
        var = jnp.ones((bf,), jnp.float32)
        return gamma, beta, mean, var

    bn1 = bn_params(ks[3], ks[4])
    bnd = bn_params(ks[5], ks[6])
    bn2 = bn_params(ks[7], ks[8])
    return (w1, bn1, wd, bnd, w2, bn2)


def fold_params(raw):
    (w1, bn1, wd, bnd, w2, bn2) = raw

    def fold(w, bn):
        gamma, beta, mean, var = bn
        scale = gamma / jnp.sqrt(var + BN_EPS)
        w_eff = w * scale[:, None, None, None]
        b_eff = beta - mean * scale
        return w_eff, b_eff

    w1e, b1e = fold(w1, bn1)
    wde, bde = fold(wd, bnd)
    w2e, b2e = fold(w2, bn2)
    bf = w1.shape[0]
    return (w1e.reshape(bf, bf), b1e,
            wde.reshape(bf, 9), bde,
            w2e.reshape(bf, bf), b2e)


# ----------------------------------------------------------------------------
# Pure-JAX reference (from raw params, PyTorch semantics)
# ----------------------------------------------------------------------------
def reference(x, raw):
    (w1, bn1, wd, bnd, w2, bn2) = raw
    B, C, H, W = x.shape
    bf = C // 2

    def bn(y, p):
        g, b, m, v = p
        g = g[None, :, None, None]
        b = b[None, :, None, None]
        m = m[None, :, None, None]
        v = v[None, :, None, None]
        return (y - m) / jnp.sqrt(v + BN_EPS) * g + b

    x1, x2 = x[:, :bf], x[:, bf:]
    dn = lax.conv_dimension_numbers(x2.shape, w1.shape, ('NCHW', 'OIHW', 'NCHW'))

    t = lax.conv_general_dilated(x2, w1, (1, 1), 'VALID', dimension_numbers=dn,
                                 precision=lax.Precision.HIGHEST)
    t = jax.nn.relu(bn(t, bn1))

    dnd = lax.conv_dimension_numbers(t.shape, wd.shape, ('NCHW', 'OIHW', 'NCHW'))
    d = lax.conv_general_dilated(t, wd, (1, 1), ((1, 1), (1, 1)),
                                 dimension_numbers=dnd, feature_group_count=bf,
                                 precision=lax.Precision.HIGHEST)
    d = bn(d, bnd)

    u = lax.conv_general_dilated(d, w2, (1, 1), 'VALID', dimension_numbers=dn,
                                 precision=lax.Precision.HIGHEST)
    u = jax.nn.relu(bn(u, bn2))

    out = jnp.concatenate([x1, u], axis=1)
    out = out.reshape(B, 2, C // 2, H, W).transpose(0, 2, 1, 3, 4).reshape(B, C, H, W)
    return out


# ----------------------------------------------------------------------------
if __name__ == "__main__":
    B, inp, oup, H, W = 2, 4, 4, 16, 16     # stride=1 requires inp == oup
    stride = 1
    bf = oup // 2
    assert inp == bf << 1

    key = jax.random.PRNGKey(0)
    k_x, k_p = jax.random.split(key)
    x = jax.random.normal(k_x, (B, inp, H, W), jnp.float32)

    raw = make_raw_params(k_p, bf)
    folded = fold_params(raw)

    out = inverted_residual(x, folded, stride=stride)
    out = jax.block_until_ready(out)

    ref = reference(x, raw)
    assert out.shape == (B, oup, H, W)
    max_err = jnp.max(jnp.abs(out - ref))
    assert jnp.allclose(out, ref, atol=2e-3, rtol=2e-3), \
        f"mismatch: max abs err {max_err}"

    print("KERNEL_OK")
</pallas_src>

<mosaic_0001>
module attributes {stable_mosaic.version = 11 : i64} {
  func.func @_inverted_residual_s1_kernel(%arg0: i32, %arg1: memref<1x4x256xf32, #tpu.memory_space<vmem>>, %arg2: memref<2x2xf32, #tpu.memory_space<vmem>>, %arg3: memref<2x1xf32, #tpu.memory_space<vmem>>, %arg4: memref<9x2x1xf32, #tpu.memory_space<vmem>>, %arg5: memref<2x2xf32, #tpu.memory_space<vmem>>, %arg6: memref<2x1xf32, #tpu.memory_space<vmem>>, %arg7: memref<1x2x512xf32, #tpu.memory_space<vmem>>) attributes {dimension_semantics = [#tpu.dimension_semantics<parallel>], iteration_bounds = array<i64: 2>, scalar_prefetch = 0 : i64, scratch_operands = 0 : i64, tpu.core_type = #tpu.core_type<tc>, window_params = [{transform_indices = @transform_0, window_bounds = array<i64: 1, 4, 256>}, {pipeline_mode = #tpu.pipeline_mode<synchronous>, transform_indices = @transform_1, window_bounds = array<i64: 2, 2>}, {pipeline_mode = #tpu.pipeline_mode<synchronous>, transform_indices = @transform_2, window_bounds = array<i64: 2, 1>}, {pipeline_mode = #tpu.pipeline_mode<synchronous>, transform_indices = @transform_3, window_bounds = array<i64: 9, 2, 1>}, {pipeline_mode = #tpu.pipeline_mode<synchronous>, transform_indices = @transform_4, window_bounds = array<i64: 2, 2>}, {pipeline_mode = #tpu.pipeline_mode<synchronous>, transform_indices = @transform_5, window_bounds = array<i64: 2, 1>}, {transform_indices = @transform_6, window_bounds = array<i64: 1, 2, 512>}]} {
    %c0 = arith.constant 0 : index
    %c0_0 = arith.constant 0 : index
    %c0_1 = arith.constant 0 : index
    %0 = vector.load %arg1[%c0, %c0_0, %c0_1] : memref<1x4x256xf32, #tpu.memory_space<vmem>>, vector<1x2x256xf32>
    %1 = vector.shape_cast %0 : vector<1x2x256xf32> to vector<2x256xf32>
    %c0_2 = arith.constant 0 : index
    %c2 = arith.constant 2 : index
    %c0_3 = arith.constant 0 : index
    %2 = vector.load %arg1[%c0_2, %c2, %c0_3] : memref<1x4x256xf32, #tpu.memory_space<vmem>>, vector<1x2x256xf32>
    %3 = vector.shape_cast %2 : vector<1x2x256xf32> to vector<2x256xf32>
    %c0_4 = arith.constant 0 : index
    %c0_5 = arith.constant 0 : index
    %4 = vector.load %arg2[%c0_4, %c0_5] : memref<2x2xf32, #tpu.memory_space<vmem>>, vector<2x2xf32>
    %cst = arith.constant dense<0.000000e+00> : vector<2x256xf32>
    %5 = tpu.matmul %4, %3, %cst {dimension_numbers = #tpu.dot_dimension_numbers<[1], [0], [0], [1], [0, 0, 1, 1], [], []>, precision = #tpu.contract_precision<fp32>} : vector<2x2xf32>, vector<2x256xf32>, vector<2x256xf32> -> vector<2x256xf32>
    %c0_6 = arith.constant 0 : index
    %c0_7 = arith.constant 0 : index
    %6 = vector.load %arg3[%c0_6, %c0_7] : memref<2x1xf32, #tpu.memory_space<vmem>>, vector<2x1xf32>
    %7 = vector.broadcast %6 : vector<2x1xf32> to vector<2x256xf32>
    %8 = arith.addf %5, %7 : vector<2x256xf32>
    %cst_8 = arith.constant 0.000000e+00 : f32
    %9 = vector.broadcast %cst_8 : f32 to vector<2x256xf32>
    %10 = arith.maximumf %8, %9 : vector<2x256xf32>
    %11 = tpu.iota {dimensions = array<i32: 1>} : vector<1x256xi32>
    %c15_i32 = arith.constant 15 : i32
    %12 = vector.broadcast %c15_i32 : i32 to vector<1x256xi32>
    %13 = arith.andi %11, %12 : vector<1x256xi32>
    %c4_i32 = arith.constant 4 : i32
    %14 = vector.broadcast %c4_i32 : i32 to vector<1x256xi32>
    %15 = arith.shrsi %11, %14 : vector<1x256xi32>
    %c1_i32 = arith.constant 1 : i32
    %16 = vector.broadcast %c1_i32 : i32 to vector<1x256xi32>
    %17 = arith.cmpi sge, %15, %16 : vector<1x256xi32>
    %c1_i32_9 = arith.constant 1 : i32
    %18 = vector.broadcast %c1_i32_9 : i32 to vector<1x256xi32>
    %19 = arith.cmpi sge, %13, %18 : vector<1x256xi32>
    %c17_i32 = arith.constant 17 : i32
    %20 = tpu.dynamic_rotate %10 by %c17_i32 dim 1 : vector<2x256xf32>, i32 -> vector<2x256xf32>
    %21 = arith.andi %17, %19 : vector<1x256xi1>
    %cst_10 = arith.constant 0.000000e+00 : f32
    %22 = vector.shape_cast %21 : vector<1x256xi1> to vector<1x256xi1>
    %23 = vector.broadcast %22 : vector<1x256xi1> to vector<2x256xi1>
    %24 = vector.broadcast %cst_10 : f32 to vector<2x256xf32>
    %25 = arith.select %23, %20, %24 : vector<2x256xi1>, vector<2x256xf32>
    %c0_11 = arith.constant 0 : index
    %c0_12 = arith.constant 0 : index
    %c0_13 = arith.constant 0 : index
    %26 = vector.load %arg4[%c0_11, %c0_12, %c0_13] : memref<9x2x1xf32, #tpu.memory_space<vmem>>, vector<1x2x1xf32>
    %27 = vector.shape_cast %26 : vector<1x2x1xf32> to vector<2x1xf32>
    %28 = vector.broadcast %27 : vector<2x1xf32> to vector<2x256xf32>
    %29 = arith.mulf %28, %25 : vector<2x256xf32>
    %c16_i32 = arith.constant 16 : i32
    %30 = tpu.dynamic_rotate %10 by %c16_i32 dim 1 : vector<2x256xf32>, i32 -> vector<2x256xf32>
    %cst_14 = arith.constant 0.000000e+00 : f32
    %31 = vector.shape_cast %17 : vector<1x256xi1> to vector<1x256xi1>
    %32 = vector.broadcast %31 : vector<1x256xi1> to vector<2x256xi1>
    %33 = vector.broadcast %cst_14 : f32 to vector<2x256xf32>
    %34 = arith.select %32, %30, %33 : vector<2x256xi1>, vector<2x256xf32>
    %c1 = arith.constant 1 : index
    %c0_15 = arith.constant 0 : index
    %c0_16 = arith.constant 0 : index
    %35 = vector.load %arg4[%c1, %c0_15, %c0_16] : memref<9x2x1xf32, #tpu.memory_space<vmem>>, vector<1x2x1xf32>
    %36 = vector.shape_cast %35 : vector<1x2x1xf32> to vector<2x1xf32>
    %37 = vector.broadcast %36 : vector<2x1xf32> to vector<2x256xf32>
    %38 = arith.mulf %37, %34 : vector<2x256xf32>
    %39 = arith.addf %29, %38 : vector<2x256xf32>
    %c14_i32 = arith.constant 14 : i32
    %40 = vector.broadcast %c14_i32 : i32 to vector<1x256xi32>
    %41 = arith.cmpi sle, %13, %40 : vector<1x256xi32>
    %c15_i32_17 = arith.constant 15 : i32
    %42 = tpu.dynamic_rotate %10 by %c15_i32_17 dim 1 : vector<2x256xf32>, i32 -> vector<2x256xf32>
    %43 = arith.andi %17, %41 : vector<1x256xi1>
    %cst_18 = arith.constant 0.000000e+00 : f32
    %44 = vector.shape_cast %43 : vector<1x256xi1> to vector<1x256xi1>
    %45 = vector.broadcast %44 : vector<1x256xi1> to vector<2x256xi1>
    %46 = vector.broadcast %cst_18 : f32 to vector<2x256xf32>
    %47 = arith.select %45, %42, %46 : vector<2x256xi1>, vector<2x256xf32>
    %c2_19 = arith.constant 2 : index
    %c0_20 = arith.constant 0 : index
    %c0_21 = arith.constant 0 : index
    %48 = vector.load %arg4[%c2_19, %c0_20, %c0_21] : memref<9x2x1xf32, #tpu.memory_space<vmem>>, vector<1x2x1xf32>
    %49 = vector.shape_cast %48 : vector<1x2x1xf32> to vector<2x1xf32>
    %50 = vector.broadcast %49 : vector<2x1xf32> to vector<2x256xf32>
    %51 = arith.mulf %50, %47 : vector<2x256xf32>
    %52 = arith.addf %39, %51 : vector<2x256xf32>
    %c1_i32_22 = arith.constant 1 : i32
    %53 = vector.broadcast %c1_i32_22 : i32 to vector<1x256xi32>
    %54 = arith.cmpi sge, %13, %53 : vector<1x256xi32>
    %c1_i32_23 = arith.constant 1 : i32
    %55 = tpu.dynamic_rotate %10 by %c1_i32_23 dim 1 : vector<2x256xf32>, i32 -> vector<2x256xf32>
    %cst_24 = arith.constant 0.000000e+00 : f32
    %56 = vector.shape_cast %54 : vector<1x256xi1> to vector<1x256xi1>
    %57 = vector.broadcast %56 : vector<1x256xi1> to vector<2x256xi1>
    %58 = vector.broadcast %cst_24 : f32 to vector<2x256xf32>
    %59 = arith.select %57, %55, %58 : vector<2x256xi1>, vector<2x256xf32>
    %c3 = arith.constant 3 : index
    %c0_25 = arith.constant 0 : index
    %c0_26 = arith.constant 0 : index
    %60 = vector.load %arg4[%c3, %c0_25, %c0_26] : memref<9x2x1xf32, #tpu.memory_space<vmem>>, vector<1x2x1xf32>
    %61 = vector.shape_cast %60 : vector<1x2x1xf32> to vector<2x1xf32>
    %62 = vector.broadcast %61 : vector<2x1xf32> to vector<2x256xf32>
    %63 = arith.mulf %62, %59 : vector<2x256xf32>
    %64 = arith.addf %52, %63 : vector<2x256xf32>
    %c4 = arith.constant 4 : index
    %c0_27 = arith.constant 0 : index
    %c0_28 = arith.constant 0 : index
    %65 = vector.load %arg4[%c4, %c0_27, %c0_28] : memref<9x2x1xf32, #tpu.memory_space<vmem>>, vector<1x2x1xf32>
    %66 = vector.shape_cast %65 : vector<1x2x1xf32> to vector<2x1xf32>
    %67 = vector.broadcast %66 : vector<2x1xf32> to vector<2x256xf32>
    %68 = arith.mulf %67, %10 : vector<2x256xf32>
    %69 = arith.addf %64, %68 : vector<2x256xf32>
    %c14_i32_29 = arith.constant 14 : i32
    %70 = vector.broadcast %c14_i32_29 : i32 to vector<1x256xi32>
    %71 = arith.cmpi sle, %13, %70 : vector<1x256xi32>
    %c255_i32 = arith.constant 255 : i32
    %72 = tpu.dynamic_rotate %10 by %c255_i32 dim 1 : vector<2x256xf32>, i32 -> vector<2x256xf32>
    %cst_30 = arith.constant 0.000000e+00 : f32
    %73 = vector.shape_cast %71 : vector<1x256xi1> to vector<1x256xi1>
    %74 = vector.broadcast %73 : vector<1x256xi1> to vector<2x256xi1>
    %75 = vector.broadcast %cst_30 : f32 to vector<2x256xf32>
    %76 = arith.select %74, %72, %75 : vector<2x256xi1>, vector<2x256xf32>
    %c5 = arith.constant 5 : index
    %c0_31 = arith.constant 0 : index
    %c0_32 = arith.constant 0 : index
    %77 = vector.load %arg4[%c5, %c0_31, %c0_32] : memref<9x2x1xf32, #tpu.memory_space<vmem>>, vector<1x2x1xf32>
    %78 = vector.shape_cast %77 : vector<1x2x1xf32> to vector<2x1xf32>
    %79 = vector.broadcast %78 : vector<2x1xf32> to vector<2x256xf32>
    %80 = arith.mulf %79, %76 : vector<2x256xf32>
    %81 = arith.addf %69, %80 : vector<2x256xf32>
    %c14_i32_33 = arith.constant 14 : i32
    %82 = vector.broadcast %c14_i32_33 : i32 to vector<1x256xi32>
    %83 = arith.cmpi sle, %15, %82 : vector<1x256xi32>
    %c1_i32_34 = arith.constant 1 : i32
    %84 = vector.broadcast %c1_i32_34 : i32 to vector<1x256xi32>
    %85 = arith.cmpi sge, %13, %84 : vector<1x256xi32>
    %c241_i32 = arith.constant 241 : i32
    %86 = tpu.dynamic_rotate %10 by %c241_i32 dim 1 : vector<2x256xf32>, i32 -> vector<2x256xf32>
    %87 = arith.andi %83, %85 : vector<1x256xi1>
    %cst_35 = arith.constant 0.000000e+00 : f32
    %88 = vector.shape_cast %87 : vector<1x256xi1> to vector<1x256xi1>
    %89 = vector.broadcast %88 : vector<1x256xi1> to vector<2x256xi1>
    %90 = vector.broadcast %cst_35 : f32 to vector<2x256xf32>
    %91 = arith.select %89, %86, %90 : vector<2x256xi1>, vector<2x256xf32>
    %c6 = arith.constant 6 : index
    %c0_36 = arith.constant 0 : index
    %c0_37 = arith.constant 0 : index
    %92 = vector.load %arg4[%c6, %c0_36, %c0_37] : memref<9x2x1xf32, #tpu.memory_space<vmem>>, vector<1x2x1xf32>
    %93 = vector.shape_cast %92 : vector<1x2x1xf32> to vector<2x1xf32>
    %94 = vector.broadcast %93 : vector<2x1xf32> to vector<2x256xf32>
    %95 = arith.mulf %94, %91 : vector<2x256xf32>
    %96 = arith.addf %81, %95 : vector<2x256xf32>
    %c240_i32 = arith.constant 240 : i32
    %97 = tpu.dynamic_rotate %10 by %c240_i32 dim 1 : vector<2x256xf32>, i32 -> vector<2x256xf32>
    %cst_38 = arith.constant 0.000000e+00 : f32
    %98 = vector.shape_cast %83 : vector<1x256xi1> to vector<1x256xi1>
    %99 = vector.broadcast %98 : vector<1x256xi1> to vector<2x256xi1>
    %100 = vector.broadcast %cst_38 : f32 to vector<2x256xf32>
    %101 = arith.select %99, %97, %100 : vector<2x256xi1>, vector<2x256xf32>
    %c7 = arith.constant 7 : index
    %c0_39 = arith.constant 0 : index
    %c0_40 = arith.constant 0 : index
    %102 = vector.load %arg4[%c7, %c0_39, %c0_40] : memref<9x2x1xf32, #tpu.memory_space<vmem>>, vector<1x2x1xf32>
    %103 = vector.shape_cast %102 : vector<1x2x1xf32> to vector<2x1xf32>
    %104 = vector.broadcast %103 : vector<2x1xf32> to vector<2x256xf32>
    %105 = arith.mulf %104, %101 : vector<2x256xf32>
    %106 = arith.addf %96, %105 : vector<2x256xf32>
    %c14_i32_41 = arith.constant 14 : i32
    %107 = vector.broadcast %c14_i32_41 : i32 to vector<1x256xi32>
    %108 = arith.cmpi sle, %13, %107 : vector<1x256xi32>
    %c239_i32 = arith.constant 239 : i32
    %109 = tpu.dynamic_rotate %10 by %c239_i32 dim 1 : vector<2x256xf32>, i32 -> vector<2x256xf32>
    %110 = arith.andi %83, %108 : vector<1x256xi1>
    %cst_42 = arith.constant 0.000000e+00 : f32
    %111 = vector.shape_cast %110 : vector<1x256xi1> to vector<1x256xi1>
    %112 = vector.broadcast %111 : vector<1x256xi1> to vector<2x256xi1>
    %113 = vector.broadcast %cst_42 : f32 to vector<2x256xf32>
    %114 = arith.select %112, %109, %113 : vector<2x256xi1>, vector<2x256xf32>
    %c8 = arith.constant 8 : index
    %c0_43 = arith.constant 0 : index
    %c0_44 = arith.constant 0 : index
    %115 = vector.load %arg4[%c8, %c0_43, %c0_44] : memref<9x2x1xf32, #tpu.memory_space<vmem>>, vector<1x2x1xf32>
    %116 = vector.shape_cast %115 : vector<1x2x1xf32> to vector<2x1xf32>
    %117 = vector.broadcast %116 : vector<2x1xf32> to vector<2x256xf32>
    %118 = arith.mulf %117, %114 : vector<2x256xf32>
    %119 = arith.addf %106, %118 : vector<2x256xf32>
    %c0_45 = arith.constant 0 : index
    %c0_46 = arith.constant 0 : index
    %120 = vector.load %arg5[%c0_45, %c0_46] : memref<2x2xf32, #tpu.memory_space<vmem>>, vector<2x2xf32>
    %cst_47 = arith.constant dense<0.000000e+00> : vector<2x256xf32>
    %121 = tpu.matmul %120, %119, %cst_47 {dimension_numbers = #tpu.dot_dimension_numbers<[1], [0], [0], [1], [0, 0, 1, 1], [], []>, precision = #tpu.contract_precision<fp32>} : vector<2x2xf32>, vector<2x256xf32>, vector<2x256xf32> -> vector<2x256xf32>
    %c0_48 = arith.constant 0 : index
    %c0_49 = arith.constant 0 : index
    %122 = vector.load %arg6[%c0_48, %c0_49] : memref<2x1xf32, #tpu.memory_space<vmem>>, vector<2x1xf32>
    %123 = vector.broadcast %122 : vector<2x1xf32> to vector<2x256xf32>
    %124 = arith.addf %121, %123 : vector<2x256xf32>
    %cst_50 = arith.constant 0.000000e+00 : f32
    %125 = vector.broadcast %cst_50 : f32 to vector<2x256xf32>
    %126 = arith.maximumf %124, %125 : vector<2x256xf32>
    %c0_51 = arith.constant 0 : index
    %c0_52 = arith.constant 0 : index
    %c0_53 = arith.constant 0 : index
    %127 = vector.load %arg7[%c0_51, %c0_52, %c0_53] : memref<1x2x512xf32, #tpu.memory_space<vmem>>, vector<1x2x256xf32>
    %128 = vector.shape_cast %127 : vector<1x2x256xf32> to vector<2x256xf32>
    %129 = vector.shape_cast %1 : vector<2x256xf32> to vector<1x2x256xf32>
    tpu.vector_store %arg7[%c0_51, %c0_52, %c0_53], %129 {strides = array<i32>} : memref<1x2x512xf32, #tpu.memory_space<vmem>>, vector<1x2x256xf32>,
    %c0_54 = arith.constant 0 : index
    %c0_55 = arith.constant 0 : index
    %c256 = arith.constant 256 : index
    %130 = vector.load %arg7[%c0_54, %c0_55, %c256] : memref<1x2x512xf32, #tpu.memory_space<vmem>>, vector<1x2x256xf32>
    %131 = vector.shape_cast %130 : vector<1x2x256xf32> to vector<2x256xf32>
    %132 = vector.shape_cast %126 : vector<2x256xf32> to vector<1x2x256xf32>
    tpu.vector_store %arg7[%c0_54, %c0_55, %c256], %132 {strides = array<i32>} : memref<1x2x512xf32, #tpu.memory_space<vmem>>, vector<1x2x256xf32>,
    return
  }
  func.func @transform_0(%arg0: i32) -> (i32, i32, i32) {
    %c0_i32 = arith.constant 0 : i32
    %c0_i32_0 = arith.constant 0 : i32
    %c0_i32_1 = arith.constant 0 : i32
    return %arg0, %c0_i32, %c0_i32_0 : i32, i32, i32
  }
  func.func @transform_1(%arg0: i32) -> (i32, i32) {
    %c0_i32 = arith.constant 0 : i32
    %c0_i32_0 = arith.constant 0 : i32
    %c0_i32_1 = arith.constant 0 : i32
    return %c0_i32, %c0_i32_0 : i32, i32
  }
  func.func @transform_2(%arg0: i32) -> (i32, i32) {
    %c0_i32 = arith.constant 0 : i32
    %c0_i32_0 = arith.constant 0 : i32
    %c0_i32_1 = arith.constant 0 : i32
    return %c0_i32, %c0_i32_0 : i32, i32
  }
  func.func @transform_3(%arg0: i32) -> (i32, i32, i32) {
    %c0_i32 = arith.constant 0 : i32
    %c0_i32_0 = arith.constant 0 : i32
    %c0_i32_1 = arith.constant 0 : i32
    %c0_i32_2 = arith.constant 0 : i32
    return %c0_i32, %c0_i32_0, %c0_i32_1 : i32, i32, i32
  }
  func.func @transform_4(%arg0: i32) -> (i32, i32) {
    %c0_i32 = arith.constant 0 : i32
    %c0_i32_0 = arith.constant 0 : i32
    %c0_i32_1 = arith.constant 0 : i32
    return %c0_i32, %c0_i32_0 : i32, i32
  }
  func.func @transform_5(%arg0: i32) -> (i32, i32) {
    %c0_i32 = arith.constant 0 : i32
    %c0_i32_0 = arith.constant 0 : i32
    %c0_i32_1 = arith.constant 0 : i32
    return %c0_i32, %c0_i32_0 : i32, i32
  }
  func.func @transform_6(%arg0: i32) -> (i32, i32, i32) {
    %c0_i32 = arith.constant 0 : i32
    %c0_i32_0 = arith.constant 0 : i32
    %c0_i32_1 = arith.constant 0 : i32
    return %arg0, %c0_i32, %c0_i32_0 : i32, i32, i32
  }
}

</mosaic_0001>

<bundles_post_ra>
// kernel: tpu_custom_call.1
= control target key start
LH: loop header
LB: loop body
LE: loop exit
PB: predicated region body
PF: predicated region fallthrough
CT: control target
= control target key end

     0   :  { %11 = vsyncpa [#allocation3], 0  ;;  %s1700_s0 = inlined_call_operand.vmem [shape: f32[2,4,256], index: 0, kind: input, shape index: {}]   ;;  %s1701_s1 = inlined_call_operand.vmem [shape: f32[2,2], index: 1, kind: input, shape index: {}]   ;;  %s1702_s2 = inlined_call_operand.vmem [shape: f32[2,1], index: 2, kind: input, shape index: {}]   ;;  %s1703_s3 = inlined_call_operand.vmem [shape: f32[9,2,1], index: 3, kind: input, shape index: {}]   ;;  %s1704_s4 = inlined_call_operand.vmem [shape: f32[2,2], index: 4, kind: input, shape index: {}]   ;;  %s1705_s5 = inlined_call_operand.vmem [shape: f32[2,1], index: 5, kind: input, shape index: {}]   ;;  %s1706_s6 = inlined_call_operand.hbm [shape: f32[2,2,512], index: 6, kind: output, shape index: {}]  }
   0x1   :  { %13 = vsyncpa [#allocation3 + $0x1], 0  ;;  %s1369_s21 = smov 0   ;;  %s1371_s22 = smov 0  }
   0x2   :  { %s1373_s23 = smov 0   ;;  %s1375_s24 = smov 0  }
   0x3 LB: > { %s1390_s25 = sadd.s32 4294967295, %s1323_s24   ;;  %s1188_s26 = sadd.s32 4294967294, %s1323_s24   ;;  %s1323_s24 = sphi %s1375_s24, %s1734_s24   ;;  %s1319_s23 = sphi %s1373_s23, %s1733_s23   ;;  %s1315_s22 = sphi %s1371_s22, %s1732_s22   ;;  %s1311_s21 = sphi %s1369_s21, %s1731_s21  }
   0x4   : > { %s1394_s27 = sadd.s32 1, %s1323_s24   ;;  %s157_s28 = sadd.s32 1, %s1319_s23 }
   0x5   : > { %s154_s29 = ssub.s32 %s1323_s24, %s1394_s27  ;;  %p167_p0 = scmp.ne.s32.totalorder %s1319_s23, %s1315_s22 }
   0x6   : > { %p155_p1 = scmp.eq.s32.totalorder %s154_s29, 0  ;;  %p168_p2 = scmp.eq.s32.totalorder %s1390_s25, 1 }
   0x7   : > { %p173_p3 = scmp.ne.s32.totalorder %s1315_s22, %s1311_s21  ;;  %p174_p4 = scmp.eq.s32.totalorder %s1188_s26, 1 }
   0x8   : > { %s1405_s30 = scalar_select %p155_p1, %s1319_s23, %s157_s28  }
   0x9   : > { %p1407_p5 = por %p168_p2, %p167_p0  ;;  %p1411_p6 = por %p174_p4, %p173_p3 }
   0xa   : > { %p1191_p7 = scmp.ge.s32.totalorder %s1323_s24, 1  ;;  %p215_p8 = scmp.lt.s32.totalorder %s1323_s24, 3 }
   0xc   : > { %p216_p9 = pnand %p1191_p7, %p215_p8 }
   0xd   : > { %p245_p10 = scmp.lt.s32.totalorder (!%p216_p9), %s1390_s25, 1  ;;  %s1326_s18 = smov (!%p216_p9), 127  }
   0xe   : > { %219 = sbr.rel (%p216_p9) target bundleno = 511 (0x1ff), region = 44  ;;  %s1327_s19 = smov (!%p216_p9), 16  }
   0xf   : > { %s1328_s20 = smov (!%p216_p9), 17   ;;  %s1329_s26 = smov (!%p216_p9), 113  }
  0x10   : > { %s1330_s28 = smov (!%p216_p9), 15   ;;  %s1331_s29 = smov (!%p216_p9), 1  }
  0x11   : > { %s1332_s9 = smov (!%p216_p9), 112   ;;  %s1333_s12 = smov (!%p216_p9), 111  }
  0x13   : > { %v253_v0 = vld [vmem:[%s1702_s2] sm:$0x3]  ;;  %v1325_v1 = vmov 0   ;;  %vm265_vm0 = vcmask 15360   ;;  %s246_s13 = scalar_select %p245_p10, %s1390_s25, 1  ;;  %vm1707_vm1 = vcmask 1041408  }
  0x14   : > { %1258 = vset.pattern.permute.xlu0 %v1325_v1  ;;  %v252_v2 = vld [vmem:[%s1701_s1] sm:$0x3]  ;;  %1260 = vset.pattern.permute.xlu1 %v1325_v1  ;;  %v1195_v7 = vld [vmem:[%s1703_s3 + $0x2] sm:$0x3]  ;;  %v1198_v10 = vld [vmem:[%s1703_s3 + $0x8] sm:$0x3] }
  0x15   : > { %256 = vperm.xlu0 %1258, %v253_v0   ;;  %v267_v3 = vsel %vm265_vm0, %v252_v2, 0  ;;  %1259 = vset.pattern.permute.xlu2 %v1325_v1  ;;  %s1208_s14 = sshll.u32 %s246_s13, 3  ;;  %v1196_v14 = vld [vmem:[%s1703_s3 + $0x4] sm:$0x3]  ;;  %v1197_v25 = vld [vmem:[%s1703_s3 + $0x6] sm:$0x3] }
  0x16   : > { %v291_v4 = vand.u32 4294901760, %v267_v3  ;;  %s1429_s17 = scalar_lea.vmem %s1700_s0, %s1208_s14  ;;  %682 = vperm.xlu1 %1260, %v1198_v10   ;;  %v1199_v30 = vld [vmem:[%s1703_s3 + $0xa] sm:$0x3]  ;;  %v1200_v31 = vld [vmem:[%s1703_s3 + $0xc] sm:$0x3]  ;;  %v568_v10 = vlaneseq }
  0x17   : > { %v251_v6 = vld [vmem:[%s1429_s17] sm:$0xcc]  ;;  %v594_v32 = vld [vmem:[%s1703_s3] sm:$0x3]  ;;  %v1201_v60 = vld [vmem:[%s1703_s3 + $0xe] sm:$0x3] }
  0x18   : > { %v292_v5 = vsub.f32 %v267_v3, %v291_v4  ;;  %260 = vst [vmem:[#allocation1] ss:$2 sm:$0xff] %v251_v6  ;;  %597 = vperm.xlu2 %1259, %v594_v32   ;;  %v1202_v61 = vld [vmem:[%s1703_s3 + $0x10] sm:$0x3]  ;;  %v792_v62 = vld [vmem:[%s1705_s5] sm:$0x3] }
  0x1a   : > { %v293_v8 = vand.u32 4294901760, %v292_v5 }
  0x1c   : > { %v294_v9 = vsub.f32 %v292_v5, %v293_v8 }
  0x1d   : > { %619 = vperm.xlu0 %1258, %v1195_v7  }
  0x1e   : > { %v295_v17 = vand.u32 4294901760, %v294_v9  ;;  %706 = vperm.xlu1 %1260, %v1199_v30  }
  0x1f   : > { %v261_v11 = vld.sshfl [vmem:[#allocation1] sm:$0xff pattern:$0x75316420]  ;;  %v262_v12 = vld.sshfl [vmem:[#allocation1 + $0x8] sm:$0xff pattern:$0x75316420] }
  0x20   : > { %v263_v13 = vrot.slane %v261_v11, 2  ;;  %v264_v15 = vrot.slane %v262_v12, 2 }
  0x22   : > { %v270_v16 = vsel %vm1707_vm1, %v263_v13, 0  ;;  %v272_v18 = vsel %vm1707_vm1, %v264_v15, 0  ;;  %v1498_v13 = vand.u32 127, %v568_v10 }
  0x23   : > { %v289_v19 = vand.u32 4294901760, %v270_v16  ;;  %v435_v20 = vand.u32 4294901760, %v272_v18 }
  0x24   : > { %v570_v15 = vadd.s32 128, %v1498_v13  ;;  %vm606_vm2 = vcmp.lt.s32.totalorder %v1498_v13, 16  ;;  %vm632_vm7 = vcmp.lt.s32.totalorder %v1498_v13, 15  ;;  %vm658_vm12 = vcmp.lt.s32.totalorder %v1498_v13, 1 }
  0x25   : > { %647 = vperm.xlu0 %1258, %v1196_v14   ;;  %v316_v21 = vsub.f32 %v270_v16, %v289_v19  ;;  %290 = vmatpush.msra.mxu0 %v289_v19  ;;  %v462_v22 = vsub.f32 %v272_v18, %v435_v20  ;;  %v571_v18 = vand.u32 15, %v1498_v13  ;;  %vm583_vm13 = vcmp.lt.s32.totalorder %v1498_v13, 17 }
  0x26   : > { %366 = vmatpush.msra.mxu3 %v289_v19  ;;  %296 = vmatmul.f32.vlgmr.msra.gmra.mxu0 %v295_v17  ;;  %vm693_vm15 = vcmp.lt.s32.totalorder %v1498_v13, 127  ;;  %vm719_vm14 = vcmp.lt.s32.totalorder %v1498_v13, 113 }
  0x27   : > { %370 = vmatmul.f32.vlgmr.msra.gmra.mxu3 %v293_v8  ;;  %343 = vmatpush.msra.mxu2 %v316_v21  ;;  %v317_v23 = vand.u32 4294901760, %v316_v21  ;;  %v463_v24 = vand.u32 4294901760, %v462_v22  ;;  %vm1508_vm4 = vcmp.le.s32.totalorder %v571_v18, 14  ;;  %vm1536_vm10 = vcmp.ge.s32.totalorder %v571_v18, 1 }
  0x28   : > { %346 = vmatmul.f32.vlgmr.msra.gmra.mxu2 %v292_v5  ;;  %734 = vperm.xlu1 %1260, %v1200_v31  }
  0x29   : > { %v318_v26 = vsub.f32 %v316_v21, %v317_v23  ;;  %436 = vmatpush.msrb.mxu2 %v435_v20  ;;  %392 = vmatpush.msrb.mxu0 %v317_v23  ;;  %v464_v27 = vsub.f32 %v462_v22, %v463_v24 }
  0x2b   : > { %489 = vmatpush.msra.mxu0 %v462_v22  ;;  %538 = vmatpush.msra.mxu2 %v463_v24  ;;  %v319_v28 = vand.u32 4294901760, %v318_v26  ;;  %v465_v29 = vand.u32 4294901760, %v464_v27 }
  0x2d   : > { %671 = vperm.xlu0 %1258, %v1197_v25   ;;  %320 = vmatpush.msra.mxu1 %v319_v28 }
  0x2e   : > { %466 = vmatpush.msrb.mxu3 %v465_v29  ;;  %322 = vmatmul.f32.vlgmr.msra.gmra.mxu1 %v291_v4  ;;  %v791_v29 = vld [vmem:[%s1704_s4] sm:$0x3] }
  0x2f   : > { %394 = vmatmul.f32.vlgmr.msrb.gmra.mxu0 %v291_v4  ;;  %468 = vmatmul.f32.vlgmr.msrb.gmra.mxu3 %v291_v4 }
  0x30   : > { %414 = vmatpush.msrb.mxu1 %v289_v19  ;;  %442 = vmatmul.f32.vlgmr.msrb.gmra.mxu2 %v295_v17  ;;  %v573_v17 = vshra.s32 %v1498_v13, 4  ;;  %v574_v19 = vshra.s32 %v570_v15, 4 }
  0x31   : > { %560 = vmatpush.msra.mxu3 %v435_v20 }
  0x32   : > { %512 = vmatpush.msra.mxu1 %v435_v20  ;;  %v572_v20 = vand.u32 15, %v570_v15  ;;  %vm1504_vm3 = vcmp.ge.s32.totalorder %v573_v17, 1  ;;  %vm1512_vm5 = vcmp.ge.s32.totalorder %v574_v19, 1  ;;  %vm1560_vm1 = vcmp.le.s32.totalorder %v574_v19, 14 }
  0x33   : > { %vm635_vm8 = vmand %vm1504_vm3, %vm1508_vm4 }
  0x34   : > { %vm1516_vm6 = vcmp.le.s32.totalorder %v572_v20, 14  ;;  %vm1541_vm11 = vcmp.ge.s32.totalorder %v572_v20, 1 }
  0x35   : > { %vm636_vm9 = vmand %vm1512_vm5, %vm1516_vm6 }
  0x36   : > { %416 = vmatmul.f32.vlgmr.msrb.gmra.mxu1 %v291_v4 }
  0x37   : > { %492 = vmatmul.f32.vlgmr.msra.gmra.mxu0 %v292_v5  ;;  %562 = vmatmul.f32.vlgmr.msra.gmra.mxu3 %v291_v4 }
  0x38   : > { %540 = vmatmul.f32.vlgmr.msra.gmra.mxu2 %v291_v4 }
  0x3e   : > { %516 = vmatmul.f32.vlgmr.msra.gmra.mxu1 %v293_v8 }
  0x72   : > { %v1484_v63 = vpop.permute.xlu2 %597 }
  0x87   : > { %v257_v34 = vpop.permute.xlu0 %256 }
  0x88   : > { %v1486_v0 = vpop.permute.xlu1 %682 }
  0x8f   : > { %v620_v1 = vpop.permute.xlu0 %619 }
  0x90   : > { %v1488_v3 = vpop.permute.xlu1 %706 }
  0x97   : > { %v1490_v4 = vpop.permute.xlu0 %647 }
  0x9a   : > { %v1494_v6 = vpop.permute.xlu1 %734 }
  0x9f   : > { %v1496_v7 = vpop.permute.xlu0 %671 }
  0xa3   : > { %v297_v33 = vpop.f32.mrf.mxu0 }
  0xa4   : > { %v298_v35 = vadd.f32 %v297_v33, %v257_v34 }
  0xaa   : > { %v371_v36 = vpop.f32.mrf.mxu3 }
  0xab   : > { %v323_v37 = vpop.f32.mrf.mxu1  ;;  %v347_v38 = vpop.f32.mrf.mxu2 }
  0xac   : > { %v324_v39 = vadd.f32 %v323_v37, %v298_v35  ;;  %v395_v40 = vpop.f32.mrf.mxu0 }
  0xae   : > { %v348_v41 = vadd.f32 %v347_v38, %v324_v39 }
  0xb0   : > { %v372_v42 = vadd.f32 %v371_v36, %v348_v41 }
  0xb2   : > { %v396_v43 = vadd.f32 %v395_v40, %v372_v42  ;;  %v469_v44 = vpop.f32.mrf.mxu3 }
  0xb3   : > { %v417_v45 = vpop.f32.mrf.mxu1  ;;  %v443_v46 = vpop.f32.mrf.mxu2 }
  0xb4   : > { %v418_v47 = vadd.f32 %v417_v45, %v396_v43  ;;  %v444_v48 = vadd.f32 %v443_v46, %v257_v34  ;;  %v493_v51 = vpop.f32.mrf.mxu0  ;;  %v799_v34 = vsel %vm265_vm0, %v791_v29, 0  ;;  %vm587_vm0 = vmand %vm1512_vm5, %vm1541_vm11 }
  0xb6   : > { %v1455_v49 = vmax.f32 %v418_v47, 0.0  ;;  %v470_v50 = vadd.f32 %v469_v44, %v444_v48 }
  0xb8   : > { %689 = vrot.lane.b32.xlu2 %v1455_v49, %s1326_s18  ;;  %602 = vrot.lane.b32.xlu1 %v1455_v49, %s1327_s19  ;;  %v494_v52 = vadd.f32 %v493_v51, %v470_v50 }
  0xb9   : > { %579 = vrot.lane.b32.xlu0 %v1455_v49, %s1328_s20 }
  0xba   : > { %v563_v56 = vpop.f32.mrf.mxu3 }
  0xbb   : > { %v517_v53 = vpop.f32.mrf.mxu1  ;;  %v541_v54 = vpop.f32.mrf.mxu2 }
  0xbc   : > { %v518_v55 = vadd.f32 %v517_v53, %v494_v52 }
  0xbe   : > { %v542_v57 = vadd.f32 %v541_v54, %v518_v55 }
  0xc0   : > { %v564_v58 = vadd.f32 %v563_v56, %v542_v57  ;;  %715 = vrot.lane.b32.xlu2 %v1455_v49, %s1329_s26  ;;  %628 = vrot.lane.b32.xlu1 %v1455_v49, %s1330_s28  ;;  %v1586_v57 = vand.u32 4294901760, %v799_v34 }
  0xc2   : > { %v1462_v59 = vmax.f32 %v564_v58, 0.0 }
  0xc4   : > { %691 = vrot.lane.b32.xlu0 %v1462_v59, %s1326_s18  ;;  %v686_v18 = vmul.f32 %v1486_v0, %v1462_v59  ;;  %s1281_s18 = scalar_lea.hbm %s1706_s6, 16 }
  0xc8   : > { %604 = vrot.lane.b32.xlu2 %v1462_v59, %s1327_s19  ;;  %654 = vrot.lane.b32.xlu1 %v1455_v49, %s1331_s29 }
  0xcc   : > { %717 = vrot.lane.b32.xlu0 %v1462_v59, %s1329_s26 }
  0xd0   : > { %630 = vrot.lane.b32.xlu2 %v1462_v59, %s1330_s28  ;;  %581 = vrot.lane.b32.xlu1 %v1462_v59, %s1328_s20  ;;  %s242_s20 = sand.u32 1, %s1315_s22  }
  0xd1   : > { %s1192_s26 = sshll.u32 %s242_s20, 3 }
  0xd2   : > { %s1661_s28 = scalar_lea.vmem [#allocation2], %s1192_s26 }
  0xd3   : > { %s1126_s11 = sshll.u32 %s1661_s28, 4  ;;  %s1127_s11 = int_to_ptr.vmem [resolvable:$true] %s1126_s11 }
  0xd4   : > { %743 = vrot.lane.b32.xlu0 %v1462_v59, %s1332_s9 }
  0xd8   : > { %656 = vrot.lane.b32.xlu2 %v1462_v59, %s1331_s29  ;;  %758 = vperm.xlu1 %1260, %v1201_v60  }
  0xdc   : > { %767 = vrot.lane.b32.xlu0 %v1462_v59, %s1333_s12 }
  0xe0   : > { %741 = vrot.lane.b32.xlu2 %v1455_v49, %s1332_s9  ;;  %784 = vperm.xlu1 %1260, %v1202_v61  }
  0xe8   : > { %765 = vrot.lane.b32.xlu2 %v1455_v49, %s1333_s12 }
  0xf0   : > { %795 = vperm.xlu2 %1259, %v792_v62  }
 0x112   : > { %v690_v2 = vpop.permute.xlu2 %689 }
 0x11a   : > { %v1492_v5 = vpop.permute.xlu2 %715 }
 0x122   : > { %v605_v8 = vpop.permute.xlu2 %604 }
 0x12a   : > { %v603_v9 = vpop.permute.xlu1 %602  ;;  %v631_v12 = vpop.permute.xlu2 %630 }
 0x12b   : > { %v580_v11 = vpop.permute.xlu0 %579  ;;  %v607_v26 = vsel %vm606_vm2, %v603_v9, %v605_v8  ;;  %v608_v27 = vsel %vm606_vm2, %v605_v8, %v603_v9  ;;  %vm1552_vm2 = vcmp.le.s32.totalorder %v573_v17, 14  ;;  %v685_v17 = vmul.f32 %v1486_v0, %v1455_v49 }
 0x12c   : > { %v613_v31 = vsel %vm1504_vm3, %v608_v27, 0.0  ;;  %v614_v32 = vsel %vm1512_vm5, %v607_v26, 0.0  ;;  %vm723_vm5 = vmand %vm1560_vm1, %vm1541_vm11 }
 0x12d   : > { %v622_v39 = vmul.f32 %v620_v1, %v613_v31  ;;  %v623_v40 = vmul.f32 %v620_v1, %v614_v32 }
 0x132   : > { %v629_v14 = vpop.permute.xlu1 %628  ;;  %v657_v21 = vpop.permute.xlu2 %656 }
 0x133   : > { %v633_v36 = vsel %vm632_vm7, %v629_v14, %v631_v12  ;;  %v634_v37 = vsel %vm632_vm7, %v631_v12, %v629_v14  ;;  %vm1726_vm7 = vmand %vm1504_vm3, %vm1536_vm10 }
 0x134   : > { %v641_v47 = vsel %vm635_vm8, %v634_v37, 0.0  ;;  %v642_v48 = vsel %vm636_vm9, %v633_v36, 0.0  ;;  %vm722_vm3 = vmand %vm1552_vm2, %vm1536_vm10  ;;  %vm745_vm8 = vcmp.lt.s32.totalorder %v1498_v13, 112  ;;  %vm769_vm9 = vcmp.lt.s32.totalorder %v1498_v13, 111 }
 0x135   : > { %v650_v62 = vmul.f32 %v1490_v4, %v641_v47  ;;  %v651_v1 = vmul.f32 %v1490_v4, %v642_v48 }
 0x136   : > { %v692_v16 = vpop.permute.xlu0 %691 }
 0x137   : > { %v694_v53 = vsel %vm693_vm15, %v690_v2, %v692_v16  ;;  %v695_v54 = vsel %vm693_vm15, %v692_v16, %v690_v2  ;;  %v1615_v16 = vsub.f32 %v799_v34, %v1586_v57 }
 0x138   : > { %v700_v8 = vsel %vm1508_vm4, %v694_v53, 0.0  ;;  %v701_v9 = vsel %vm1516_vm6, %v695_v54, 0.0 }
 0x139   : > { %v710_v23 = vmul.f32 %v1488_v3, %v701_v9  ;;  %v826_v31 = vand.u32 4294901760, %v1615_v16 }
 0x13a   : > { %v655_v22 = vpop.permute.xlu1 %654  ;;  %v742_v50 = vpop.permute.xlu2 %741 }
 0x13b   : > { %v659_v43 = vsel %vm658_vm12, %v655_v22, %v657_v21  ;;  %v660_v44 = vsel %vm658_vm12, %v657_v21, %v655_v22  ;;  %v709_v22 = vmul.f32 %v1488_v3, %v700_v8 }
 0x13c   : > { %v665_v58 = vsel %vm1536_vm10, %v660_v44, 0.0  ;;  %v666_v60 = vsel %vm1541_vm11, %v659_v43, 0.0  ;;  %vm772_vm10 = vmand %vm1552_vm2, %vm1508_vm4  ;;  %v827_v43 = vsub.f32 %v1615_v16, %v826_v31  ;;  %vm1727_vm4 = vcmask 1041408  }
 0x13d   : > { %v675_v12 = vmul.f32 %v1496_v7, %v666_v60  ;;  %vm773_vm11 = vmand %vm1560_vm1, %vm1516_vm6 }
 0x13e   : > { %v718_v30 = vpop.permute.xlu0 %717  ;;  %vm1728_vm6 = vmmov %vm1727_vm4 }
 0x13f   : > { %v720_v4 = vsel %vm719_vm14, %v1492_v5, %v718_v30  ;;  %v721_v10 = vsel %vm719_vm14, %v718_v30, %v1492_v5 }
 0x140   : > { %v728_v5 = vsel %vm722_vm3, %v720_v4, 0.0 }
 0x141   : > { %v737_v0 = vmul.f32 %v1494_v6, %v728_v5 }
 0x142   : > { %v582_v42 = vpop.permute.xlu1 %581  ;;  %v766_v29 = vpop.permute.xlu2 %765 }
 0x143   : > { %v584_v45 = vsel %vm583_vm13, %v580_v11, %v582_v42  ;;  %v585_v46 = vsel %vm583_vm13, %v582_v42, %v580_v11  ;;  %v674_v11 = vmul.f32 %v1496_v7, %v665_v58  ;;  %v729_v7 = vsel %vm723_vm5, %v721_v10, 0.0 }
 0x144   : > { %v592_v51 = vsel %vm1726_vm7, %v585_v46, 0.0  ;;  %v593_v52 = vsel %vm587_vm0, %v584_v45, 0.0  ;;  %v738_v27 = vmul.f32 %v1494_v6, %v729_v7 }
 0x145   : > { %v600_v55 = vmul.f32 %v1484_v63, %v592_v51  ;;  %v601_v56 = vmul.f32 %v1484_v63, %v593_v52 }
 0x146   : > { %v744_v61 = vpop.permute.xlu0 %743 }
 0x147   : > { %v624_v2 = vadd.f32 %v622_v39, %v600_v55  ;;  %v625_v63 = vadd.f32 %v623_v40, %v601_v56  ;;  %v746_v49 = vsel %vm745_vm8, %v742_v50, %v744_v61  ;;  %v747_v25 = vsel %vm745_vm8, %v744_v61, %v742_v50 }
 0x148   : > { %v752_v6 = vsel %vm1552_vm2, %v746_v49, 0.0  ;;  %v753_v24 = vsel %vm1560_vm1, %v747_v25, 0.0  ;;  %v828_v50 = vand.u32 4294901760, %v827_v43  ;;  %vm1729_vm1 = vmmov %vm1727_vm4 }
 0x149   : > { %v652_v14 = vadd.f32 %v650_v62, %v624_v2  ;;  %v653_v15 = vadd.f32 %v651_v1, %v625_v63  ;;  %v250_v1 = vld [vmem:[%s1429_s17] sm:$0x33]  ;;  %s1209_s17 = sshll.u32 %s1390_s25, 3  ;;  %vm1730_vm12 = vmmov %vm1729_vm1  ;;  %s1113_s25 = scalar_lea.sflag [#allocation3], %s242_s20 }
 0x14a   : > { %v759_v19 = vpop.permute.xlu1 %758  ;;  %v1102_v63 = vrot.slane %v250_v1, 2  ;;  %s1124_s10 = scalar_lea.hbm %s1706_s6, %s1209_s17 }
 0x14b   : > { %v676_v20 = vadd.f32 %v674_v11, %v652_v14  ;;  %v677_v21 = vadd.f32 %v675_v12, %v653_v15  ;;  %v761_v36 = vmul.f32 %v759_v19, %v752_v6  ;;  %v762_v37 = vmul.f32 %v759_v19, %v753_v24  ;;  %v796_v11 = vpop.permute.xlu2 %795  ;;  %s1128_s12 = sshll.u32 %s1124_s10, 4  ;;  %s1129_s12 = int_to_ptr.hbm [resolvable:$true] %s1128_s12 }
 0x14c   : > { %v1103_v8 = vsel %vm1729_vm1, %v250_v1, %v1102_v63  ;;  %s1275_s13 = sshra.s32 %s1129_s12, 4  ;;  %s1276_s13 = int_to_ptr.hbm [resolvable:$true] %s1275_s13 }
 0x14d   : > { %v687_v26 = vadd.f32 %v685_v17, %v676_v20  ;;  %v688_v59 = vadd.f32 %v686_v18, %v677_v21  ;;  %1105 = vst [vmem:[%s1661_s28] sm:$0xf] %v1103_v8  ;;  %s1277_s14 = scalar_lea.hbm %s1276_s13, 8  ;;  %p1282_p0 = scmp.lt.s32.totalorder %s1276_s13, %s1706_s6 }
 0x14e   : > { %v768_v30 = vpop.permute.xlu0 %767  ;;  %p1278_p11 = scmp.ne.s32.totalorder %s1276_s13, %s1277_s14  ;;  %p1283_p1 = scmp.lt.s32.totalorder %s1281_s18, %s1277_s14 }
 0x14f   : > { %v711_v3 = vadd.f32 %v709_v22, %v687_v26  ;;  %v712_v32 = vadd.f32 %v710_v23, %v688_v59  ;;  %v770_v13 = vsel %vm769_vm9, %v766_v29, %v768_v30  ;;  %v771_v33 = vsel %vm769_vm9, %v768_v30, %v766_v29 }
 0x150   : > { %v778_v40 = vsel %vm772_vm10, %v770_v13, 0.0  ;;  %v779_v42 = vsel %vm773_vm11, %v771_v33, 0.0  ;;  %p1279_p12 = pnand %p1278_p11, %p1407_p5  ;;  %p1284_p2 = por %p1283_p1, %p1282_p0 }
 0x151   : > { %v739_v34 = vadd.f32 %v737_v0, %v711_v3  ;;  %v740_v35 = vadd.f32 %v738_v27, %v712_v32 }
 0x152   : > { %v785_v39 = vpop.permute.xlu1 %784  ;;  %p1280_p13 = pneg %p1279_p12 }
 0x153   : > { %v763_v44 = vadd.f32 %v761_v36, %v739_v34  ;;  %v764_v28 = vadd.f32 %v762_v37, %v740_v35  ;;  %v787_v45 = vmul.f32 %v785_v39, %v778_v40  ;;  %v788_v46 = vmul.f32 %v785_v39, %v779_v42 }
 0x154   : > { %p1285_p3 = pnand %p1284_p2, %p1280_p13 }
 0x155   : > { %v789_v47 = vadd.f32 %v787_v45, %v763_v44  ;;  %v790_v48 = vadd.f32 %v788_v46, %v764_v28 }
 0x157   : > { %v802_v38 = vsel %vm1727_vm4, %v789_v47, 0  ;;  %v805_v41 = vsel %vm1728_vm6, %v790_v48, 0 }
 0x158   : > { %v822_v51 = vand.u32 4294901760, %v802_v38  ;;  %v968_v52 = vand.u32 4294901760, %v805_v41 }
 0x15a   : > { %v849_v53 = vsub.f32 %v802_v38, %v822_v51  ;;  %v995_v54 = vsub.f32 %v805_v41, %v968_v52  ;;  %823 = vmatpush.msrb.mxu0 %v822_v51  ;;  %899 = vmatpush.msrb.mxu3 %v822_v51 }
 0x15b   : > { %829 = vmatmul.f32.vlgmr.msrb.gmra.mxu0 %v828_v50  ;;  %903 = vmatmul.f32.vlgmr.msrb.gmra.mxu3 %v826_v31 }
 0x15c   : > { %876 = vmatpush.msrb.mxu2 %v849_v53  ;;  %v850_v55 = vand.u32 4294901760, %v849_v53  ;;  %v996_v56 = vand.u32 4294901760, %v995_v54 }
 0x15d   : > { %879 = vmatmul.f32.vlgmr.msrb.gmra.mxu2 %v1615_v16 }
 0x15e   : > { %969 = vmatpush.msra.mxu2 %v968_v52  ;;  %925 = vmatpush.msra.mxu0 %v850_v55  ;;  %v851_v58 = vsub.f32 %v849_v53, %v850_v55  ;;  %v997_v60 = vsub.f32 %v995_v54, %v996_v56 }
 0x160   : > { %1071 = vmatpush.msrb.mxu2 %v996_v56  ;;  %1022 = vmatpush.msrb.mxu0 %v995_v54  ;;  %v852_v61 = vand.u32 4294901760, %v851_v58  ;;  %v998_v62 = vand.u32 4294901760, %v997_v60 }
 0x162   : > { %853 = vmatpush.msrb.mxu1 %v852_v61  ;;  %999 = vmatpush.msra.mxu3 %v998_v62 }
 0x163   : > { %855 = vmatmul.f32.vlgmr.msrb.gmra.mxu1 %v1586_v57  ;;  %927 = vmatmul.f32.vlgmr.msra.gmra.mxu0 %v1586_v57 }
 0x164   : > { %1093 = vmatpush.msrb.mxu3 %v968_v52  ;;  %947 = vmatpush.msra.mxu1 %v822_v51 }
 0x165   : > { %975 = vmatmul.f32.vlgmr.msra.gmra.mxu2 %v828_v50  ;;  %1001 = vmatmul.f32.vlgmr.msra.gmra.mxu3 %v1586_v57 }
 0x166   : > { %1045 = vmatpush.msrb.mxu1 %v968_v52 }
 0x16b   : > { %949 = vmatmul.f32.vlgmr.msra.gmra.mxu1 %v1586_v57  ;;  %1025 = vmatmul.f32.vlgmr.msrb.gmra.mxu0 %v1615_v16 }
 0x16d   : > { %1073 = vmatmul.f32.vlgmr.msrb.gmra.mxu2 %v1586_v57  ;;  %1095 = vmatmul.f32.vlgmr.msrb.gmra.mxu3 %v1586_v57 }
 0x173   : > { %1049 = vmatmul.f32.vlgmr.msrb.gmra.mxu1 %v826_v31 }
 0x1d8   : > { %v830_v2 = vpop.f32.mrf.mxu0 }
 0x1d9   : > { %v831_v57 = vadd.f32 %v830_v2, %v796_v11 }
 0x1de   : > { %v904_v9 = vpop.f32.mrf.mxu3 }
 0x1e0   : > { %v856_v4 = vpop.f32.mrf.mxu1  ;;  %v880_v10 = vpop.f32.mrf.mxu2 }
 0x1e1   : > { %v928_v12 = vpop.f32.mrf.mxu0  ;;  %v857_v14 = vadd.f32 %v856_v4, %v831_v57 }
 0x1e3   : > { %v881_v17 = vadd.f32 %v880_v10, %v857_v14 }
 0x1e5   : > { %v905_v20 = vadd.f32 %v904_v9, %v881_v17 }
 0x1e7   : > { %v929_v49 = vadd.f32 %v928_v12, %v905_v20 }
 0x1e8   : > { %v950_v15 = vpop.f32.mrf.mxu1  ;;  %v976_v16 = vpop.f32.mrf.mxu2 }
 0x1e9   : > { %v977_v18 = vadd.f32 %v976_v16, %v796_v11  ;;  %v1002_v19 = vpop.f32.mrf.mxu3  ;;  %v1026_v7 = vpop.f32.mrf.mxu0  ;;  %v951_v0 = vadd.f32 %v950_v15, %v929_v49 }
 0x1eb   : > { %v1003_v5 = vadd.f32 %v1002_v19, %v977_v18  ;;  %v1099_v30 = vmax.f32 %v951_v0, 0.0 }
 0x1ed   : > { %v1027_v21 = vadd.f32 %v1026_v7, %v1003_v5 }
 0x1f0   : > { %v1050_v22 = vpop.f32.mrf.mxu1  ;;  %v1074_v23 = vpop.f32.mrf.mxu2 }
 0x1f1   : > { %v1051_v25 = vadd.f32 %v1050_v22, %v1027_v21  ;;  %v1096_v26 = vpop.f32.mrf.mxu3 }
 0x1f3   : > { %v1075_v59 = vadd.f32 %v1074_v23, %v1051_v25 }
 0x1f5   : > { %v1097_v27 = vadd.f32 %v1096_v26, %v1075_v59 }
 0x1f7   : > { %v1100_v29 = vmax.f32 %v1097_v27, 0.0 }
 0x1f9   : > { %v1108_v31 = vrot.slane %v1100_v29, 6 }
 0x1fb   : > { %v1109_v3 = vsel %vm1730_vm12, %v1099_v30, %v1108_v31 }
 0x1fc   : > { %1111 = vst [vmem:[%s1661_s28 + $0x4] sm:$0xf] %v1109_v3 }
 0x1fd   : > { %1288 = shalt.err (!%p1285_p3)
}
 0x1fe   : > { %1210 = dma.vmem_to_hbm [thread:$0]  (%p1407_p5), %s1127_s11, 128, %s1129_s12, %s1113_s25  }
 0x1ff PF: > { %p1216_p4 = scmp.ge.s32.totalorder %s1323_s24, 2  ;;  %s1140_s20 = sand.u32 1, %s1311_s21  }
 0x200   : > { %s1141_s28 = scalar_lea.sflag [#allocation3], %s1140_s20 }
 0x201   : > { %p1213_p7 = pnand %p1216_p4, %p1411_p6 }
 0x203   : > { %p1214_p8 = pneg %p1213_p7 }
 0x205   : > { %1306 = dma.done.wait (%p1214_p8), %s1141_s28, 128  }
 0x206   : > { %1308 = vsyncadd (%p1214_p8), %s1141_s28, 4294967168  ;;  %p16_p9 = scmp.ge.s32.totalorder %s1394_s27, 4   ;;  %s1731_s21 = smov %s1315_s22 }
 0x207   : > { %s1732_s22 = smov %s1319_s23  ;;  %s1733_s23 = smov %s1405_s30 }
 0x208   : > { %s1734_s24 = smov %s1394_s27  ;;  %18 = sbr.rel (!%p16_p9) target bundleno = 3 (0x3), region = 87 }
 0x20d   :  { %1147 = vsyncpa [#allocation3], 1 }
 0x20e   :  { %1149 = vsyncpa [#allocation3 + $0x1], 1 }

</bundles_post_ra>
